<compile_context>
chip_gen: v7x
topology: tpu7x:2x2x1
jax: 0.10.0
libtpu: 0.0.40
codegen_flags: <defaults>
</compile_context>

<pallas_src>
import functools
import math

import jax
import jax.numpy as jnp
from jax.experimental import pallas as pl
from jax.experimental.pallas import tpu as pltpu

GEM_P = 3.0
GEM_EPS = 1e-6

# Per-input-block byte budget (double-buffered by the pipeline -> ~2x this).
_BLOCK_BUDGET_BYTES = 2 * 1024 * 1024


def gem_kernel(x_ref, o_ref, acc_ref, *, p, inv_p, eps, pt, p_total,
               log_p_total, mask_tail):
    """One block: (Bt, C, Pt) native-dtype input -> (Bt, C) pooled output.

    Grid axis 0: batch blocks ("parallel").
    Grid axis 1: spatial tiles ("arbitrary") with acc_ref as the resident
                 f32 accumulator (init at kp == 0, finalize at kp == last).
    """
    kp = pl.program_id(1)

    @pl.when(kp == 0)
    def _():
        acc_ref[...] = jnp.zeros_like(acc_ref)

    x = x_ref[...].astype(jnp.float32)            # (Bt, C, Pt), upcast in VMEM
    xc = jnp.maximum(x, eps)

    if float(p) == 3.0:
        xp = xc * xc * xc                         # VPU: two multiplies, exact
    elif float(p).is_integer() and 1 <= int(p) <= 16:
        xp = xc
        for _ in range(int(p) - 1):               # small integer p: VPU only
            xp = xp * xc
    else:
        # Generic positive power: 2 EUP transcendentals per element (slow path,
        # only taken for non-integer p).
        xp = jnp.exp(jnp.log(xc) * p)

    if mask_tail:
        # Last spatial tile may be partially out of bounds: zero the padding so
        # it does not pollute the sum.
        lane = jax.lax.broadcasted_iota(jnp.int32, xp.shape, dimension=2)
        valid = (kp * pt + lane) < p_total
        xp = jnp.where(valid, xp, 0.0)

    acc_ref[...] += jnp.sum(xp, axis=-1)          # lane reduce -> (Bt, C)

    @pl.when(kp == pl.num_programs(1) - 1)
    def _():
        # mean + p-th root folded into log space: (sum / P) ** (1/p)
        # sum >= eps**p * P > 0, so log is always safe (EUP, ~free slot).
        o_ref[...] = jnp.exp(
            (jnp.log(acc_ref[...]) - log_p_total) * inv_p
        ).astype(o_ref.dtype)


def _pick_tiles(B, C, P, itemsize):
    """Choose (Bt, Pt) so one input block is ~_BLOCK_BUDGET_BYTES."""
    per_batch = C * P * itemsize
    if per_batch <= _BLOCK_BUDGET_BYTES:
        pt = P                                           # full spatial extent
        bt = max(1, min(B, _BLOCK_BUDGET_BYTES // per_batch))
    else:
        bt = 1
        pt = (_BLOCK_BUDGET_BYTES // (C * itemsize)) // 128 * 128
        pt = max(128, min(pt, P))                        # lane-aligned tile
    return bt, pt


def gem_forward(x, p=GEM_P, eps=GEM_EPS):
    """GeM pooling: (B, C, H, W) -> (B, C, 1, 1)."""
    B, C, H, W = x.shape
    P = H * W

    # Native NCHW layout: (B, C, H, W) -> (B, C, H*W) is metadata-only
    # (no transpose, no dtype conversion, no extra HBM pass).
    x3 = x.reshape(B, C, P)

    itemsize = jnp.dtype(x.dtype).itemsize
    Bt, Pt = _pick_tiles(B, C, P, itemsize)
    nb = pl.cdiv(B, Bt)
    nkp = pl.cdiv(P, Pt)
    mask_tail = (P % Pt) != 0

    kernel = functools.partial(
        gem_kernel,
        p=float(p), inv_p=1.0 / float(p), eps=float(eps),
        pt=Pt, p_total=P, log_p_total=float(math.log(P)),
        mask_tail=mask_tail)

    pooled = pl.pallas_call(
        kernel,
        out_shape=jax.ShapeDtypeStruct((B, C), x.dtype),
        grid=(nb, nkp),
        in_specs=[pl.BlockSpec((Bt, C, Pt), lambda b, k: (b, 0, k))],
        out_specs=pl.BlockSpec((Bt, C), lambda b, k: (b, 0)),
        scratch_shapes=[pltpu.VMEM((Bt, C), jnp.float32)],
        compiler_params=pltpu.CompilerParams(
            dimension_semantics=("parallel", "arbitrary")),
    )(x3)

    return pooled.reshape(B, C, 1, 1)


def gem_ref(x, p=GEM_P, eps=GEM_EPS):
    # Pure-JAX reference (mirrors the PyTorch avg_pool2d formulation).
    xc = jnp.maximum(x.astype(jnp.float32), eps)
    pooled = jnp.mean(xc ** p, axis=(2, 3))
    B, C = pooled.shape
    return (pooled ** (1.0 / p)).reshape(B, C, 1, 1).astype(x.dtype)


if __name__ == "__main__":
    key = jax.random.PRNGKey(0)
    B, C, H, W = 2, 128, 16, 16          # GeM sits after a backbone -> C = num_features
    x = jax.random.normal(key, (B, C, H, W), jnp.float32)

    out = jax.jit(gem_forward)(x)
    jax.block_until_ready(out)

    ref = gem_ref(x)
    assert out.shape == (B, C, 1, 1)
    assert bool(jnp.all(jnp.isfinite(out)))
    assert bool(jnp.allclose(out, ref, rtol=2e-5, atol=1e-6)), (
        float(jnp.max(jnp.abs(out - ref))))

    # Native bf16 input path (halves DMA bytes; compute stays in f32 in-kernel).
    xb = x.astype(jnp.bfloat16)
    outb = jax.jit(gem_forward)(xb)
    jax.block_until_ready(outb)
    refb = gem_ref(xb)
    assert outb.dtype == jnp.bfloat16 and outb.shape == (B, C, 1, 1)
    assert bool(jnp.allclose(outb.astype(jnp.float32), refb.astype(jnp.float32),
                             rtol=2e-2, atol=2e-2))

    print("KERNEL_OK")
</pallas_src>

<mosaic_0001>
module attributes {stable_mosaic.version = 11 : i64} {
  func.func @gem_kernel(%arg0: i32, %arg1: i32, %arg2: memref<2x128x256xf32, #tpu.memory_space<vmem>>, %arg3: memref<2x128xf32, #tpu.memory_space<vmem>>, %arg4: memref<2x128xf32, #tpu.memory_space<vmem>>) attributes {dimension_semantics = [#tpu.dimension_semantics<parallel>, #tpu.dimension_semantics<arbitrary>], iteration_bounds = array<i64: 1, 1>, scalar_prefetch = 0 : i64, scratch_operands = 1 : i64, tpu.core_type = #tpu.core_type<tc>, window_params = [{transform_indices = @transform_0, window_bounds = array<i64: 2, 128, 256>}, {transform_indices = @transform_1, window_bounds = array<i64: 2, 128>}]} {
    %c0_i32 = arith.constant 0 : i32
    %0 = arith.cmpi eq, %arg1, %c0_i32 : i32
    %1 = arith.extui %0 : i1 to i32
    %c0_i32_0 = arith.constant 0 : i32
    %2 = arith.cmpi ne, %1, %c0_i32_0 : i32
    scf.if %2 {
      %cst_10 = arith.constant 0.000000e+00 : f32
      %15 = vector.broadcast %cst_10 : f32 to vector<2x128xf32>
      %c0_11 = arith.constant 0 : index
      %c0_12 = arith.constant 0 : index
      %16 = vector.load %arg4[%c0_11, %c0_12] : memref<2x128xf32, #tpu.memory_space<vmem>>, vector<2x128xf32>
      tpu.vector_store %arg4[%c0_11, %c0_12], %15 {strides = array<i32>} : memref<2x128xf32, #tpu.memory_space<vmem>>, vector<2x128xf32>,
    } else {
    }
    %c0 = arith.constant 0 : index
    %c0_1 = arith.constant 0 : index
    %c0_2 = arith.constant 0 : index
    %3 = vector.load %arg2[%c0, %c0_1, %c0_2] : memref<2x128x256xf32, #tpu.memory_space<vmem>>, vector<2x128x256xf32>
    %cst = arith.constant 9.99999997E-7 : f32
    %4 = vector.broadcast %cst : f32 to vector<2x128x256xf32>
    %5 = arith.maximumf %3, %4 : vector<2x128x256xf32>
    %6 = arith.mulf %5, %5 : vector<2x128x256xf32>
    %7 = arith.mulf %6, %5 : vector<2x128x256xf32>
    %c0_3 = arith.constant 0 : index
    %c0_4 = arith.constant 0 : index
    %8 = vector.load %arg4[%c0_3, %c0_4] : memref<2x128xf32, #tpu.memory_space<vmem>>, vector<2x128xf32>
    %cst_5 = arith.constant dense<0.000000e+00> : vector<2x128xf32>
    %9 = vector.multi_reduction <add>, %7, %cst_5 [2] : vector<2x128x256xf32> to vector<2x128xf32>
    %10 = arith.addf %8, %9 : vector<2x128xf32>
    %c0_6 = arith.constant 0 : index
    %c0_7 = arith.constant 0 : index
    %11 = vector.load %arg4[%c0_6, %c0_7] : memref<2x128xf32, #tpu.memory_space<vmem>>, vector<2x128xf32>
    tpu.vector_store %arg4[%c0_6, %c0_7], %10 {strides = array<i32>} : memref<2x128xf32, #tpu.memory_space<vmem>>, vector<2x128xf32>,
    %c0_i32_8 = arith.constant 0 : i32
    %12 = arith.cmpi eq, %arg1, %c0_i32_8 : i32
    %13 = arith.extui %12 : i1 to i32
    %c0_i32_9 = arith.constant 0 : i32
    %14 = arith.cmpi ne, %13, %c0_i32_9 : i32
    scf.if %14 {
      %c0_10 = arith.constant 0 : index
      %c0_11 = arith.constant 0 : index
      %15 = vector.load %arg4[%c0_10, %c0_11] : memref<2x128xf32, #tpu.memory_space<vmem>>, vector<2x128xf32>
      %16 = math.log %15 : vector<2x128xf32>
      %cst_12 = arith.constant 5.54517746 : f32
      %17 = vector.broadcast %cst_12 : f32 to vector<2x128xf32>
      %18 = arith.subf %16, %17 : vector<2x128xf32>
      %cst_13 = arith.constant 0.333333343 : f32
      %19 = vector.broadcast %cst_13 : f32 to vector<2x128xf32>
      %20 = arith.mulf %18, %19 : vector<2x128xf32>
      %21 = math.exp %20 : vector<2x128xf32>
      %c0_14 = arith.constant 0 : index
      %c0_15 = arith.constant 0 : index
      %22 = vector.load %arg3[%c0_14, %c0_15] : memref<2x128xf32, #tpu.memory_space<vmem>>, vector<2x128xf32>
      tpu.vector_store %arg3[%c0_14, %c0_15], %21 {strides = array<i32>} : memref<2x128xf32, #tpu.memory_space<vmem>>, vector<2x128xf32>,
    } else {
    }
    return
  }
  func.func @transform_0(%arg0: i32, %arg1: i32) -> (i32, i32, i32) {
    %c0_i32 = arith.constant 0 : i32
    %c0_i32_0 = arith.constant 0 : i32
    return %arg0, %c0_i32, %arg1 : i32, i32, i32
  }
  func.func @transform_1(%arg0: i32, %arg1: i32) -> (i32, i32) {
    %c0_i32 = arith.constant 0 : i32
    %c0_i32_0 = arith.constant 0 : i32
    return %arg0, %c0_i32 : i32, i32
  }
}

</mosaic_0001>

<bundles_post_ra>
// kernel: gem_forward.1
= control target key start
LH: loop header
LB: loop body
LE: loop exit
PB: predicated region body
PF: predicated region fallthrough
CT: control target
= control target key end

     0   :  { %s1014_s0 = inlined_call_operand.vmem [shape: f32[2,128,256], index: 0, kind: input, shape index: {}]   ;;  %s1015_s1 = inlined_call_operand.hbm [shape: f32[2,128], index: 1, kind: output, shape index: {}]  }
   0x1   :  { %v46_v0 = vld [vmem:[%s1014_s0 + $0x100] sm:$0xff]  ;;  %v47_v1 = vld [vmem:[%s1014_s0 + $0x108] sm:$0xff]  ;;  %v48_v6 = vld [vmem:[%s1014_s0 + $0x110] sm:$0xff] }
   0x2   :  { %v14_v2 = vld [vmem:[%s1014_s0] sm:$0xff]  ;;  %v110_v3 = vmax.f32 %v46_v0, 1e-06  ;;  %v111_v4 = vmax.f32 %v47_v1, 1e-06  ;;  %v15_v5 = vld [vmem:[%s1014_s0 + $0x8] sm:$0xff] }
   0x3   :  { %v78_v7 = vmax.f32 %v14_v2, 1e-06  ;;  %v79_v8 = vmax.f32 %v15_v5, 1e-06  ;;  %v49_v9 = vld [vmem:[%s1014_s0 + $0x118] sm:$0xff]  ;;  %v16_v10 = vld [vmem:[%s1014_s0 + $0x10] sm:$0xff] }
   0x4   :  { %v174_v11 = vmul.f32 %v110_v3, %v110_v3  ;;  %v175_v12 = vmul.f32 %v111_v4, %v111_v4  ;;  %v112_v13 = vmax.f32 %v48_v6, 1e-06  ;;  %v113_v14 = vmax.f32 %v49_v9, 1e-06  ;;  %v17_v15 = vld [vmem:[%s1014_s0 + $0x18] sm:$0xff]  ;;  %v50_v20 = vld [vmem:[%s1014_s0 + $0x120] sm:$0xff] }
   0x5   :  { %v142_v16 = vmul.f32 %v78_v7, %v78_v7  ;;  %v143_v17 = vmul.f32 %v79_v8, %v79_v8  ;;  %v80_v18 = vmax.f32 %v16_v10, 1e-06  ;;  %v81_v19 = vmax.f32 %v17_v15, 1e-06  ;;  %v51_v25 = vld [vmem:[%s1014_s0 + $0x128] sm:$0xff]  ;;  %v18_v30 = vld [vmem:[%s1014_s0 + $0x20] sm:$0xff] }
   0x6   :  { %v238_v21 = vmul.f32 %v174_v11, %v110_v3  ;;  %v239_v22 = vmul.f32 %v175_v12, %v111_v4  ;;  %v176_v23 = vmul.f32 %v112_v13, %v112_v13  ;;  %v177_v24 = vmul.f32 %v113_v14, %v113_v14  ;;  %v19_v31 = vld [vmem:[%s1014_s0 + $0x28] sm:$0xff]  ;;  %v52_v36 = vld [vmem:[%s1014_s0 + $0x130] sm:$0xff]  ;;  %v53_v37 = vld [vmem:[%s1014_s0 + $0x138] sm:$0xff] }
   0x7   :  { %v206_v26 = vmul.f32 %v142_v16, %v78_v7  ;;  %v207_v27 = vmul.f32 %v143_v17, %v79_v8  ;;  %v144_v28 = vmul.f32 %v80_v18, %v80_v18  ;;  %v145_v29 = vmul.f32 %v81_v19, %v81_v19  ;;  %v20_v42 = vld [vmem:[%s1014_s0 + $0x30] sm:$0xff]  ;;  %v21_v47 = vld [vmem:[%s1014_s0 + $0x38] sm:$0xff]  ;;  %v54_v52 = vld [vmem:[%s1014_s0 + $0x140] sm:$0xff] }
   0x8   :  { %v319_v32 = vadd.f32 %v239_v22, %v238_v21  ;;  %v240_v33 = vmul.f32 %v176_v23, %v112_v13  ;;  %v241_v34 = vmul.f32 %v177_v24, %v113_v14  ;;  %v114_v35 = vmax.f32 %v50_v20, 1e-06  ;;  %v55_v61 = vld [vmem:[%s1014_s0 + $0x148] sm:$0xff]  ;;  %v22_v2 = vld [vmem:[%s1014_s0 + $0x40] sm:$0xff]  ;;  %v56_v8 = vld [vmem:[%s1014_s0 + $0x150] sm:$0xff] }
   0x9   :  { %v271_v38 = vadd.f32 %v207_v27, %v206_v26  ;;  %v208_v39 = vmul.f32 %v144_v28, %v80_v18  ;;  %v209_v40 = vmul.f32 %v145_v29, %v81_v19  ;;  %v115_v41 = vmax.f32 %v51_v25, 1e-06  ;;  %v23_v3 = vld [vmem:[%s1014_s0 + $0x48] sm:$0xff]  ;;  %v57_v9 = vld [vmem:[%s1014_s0 + $0x158] sm:$0xff]  ;;  %v24_v14 = vld [vmem:[%s1014_s0 + $0x50] sm:$0xff] }
   0xa   :  { %320 = vadd.xlane.f32.xlu1 %v319_v32  ;;  %v322_v43 = vadd.f32 %v241_v34, %v240_v33  ;;  %v178_v44 = vmul.f32 %v114_v35, %v114_v35  ;;  %v82_v45 = vmax.f32 %v18_v30, 1e-06  ;;  %v83_v46 = vmax.f32 %v19_v31, 1e-06  ;;  %v25_v19 = vld [vmem:[%s1014_s0 + $0x58] sm:$0xff]  ;;  %v58_v24 = vld [vmem:[%s1014_s0 + $0x160] sm:$0xff] }
   0xb   :  { %272 = vadd.xlane.f32.xlu0 %v271_v38  ;;  %v274_v48 = vadd.f32 %v209_v40, %v208_v39  ;;  %v179_v49 = vmul.f32 %v115_v41, %v115_v41  ;;  %v116_v50 = vmax.f32 %v52_v36, 1e-06  ;;  %v117_v51 = vmax.f32 %v53_v37, 1e-06  ;;  %v59_v33 = vld [vmem:[%s1014_s0 + $0x168] sm:$0xff]  ;;  %v26_v38 = vld [vmem:[%s1014_s0 + $0x60] sm:$0xff] }
   0xc   :  { %v242_v53 = vmul.f32 %v178_v44, %v114_v35  ;;  %v146_v54 = vmul.f32 %v82_v45, %v82_v45  ;;  %v147_v55 = vmul.f32 %v83_v46, %v83_v46  ;;  %v84_v56 = vmax.f32 %v20_v42, 1e-06  ;;  %v27_v39 = vld [vmem:[%s1014_s0 + $0x68] sm:$0xff]  ;;  %v60_v44 = vld [vmem:[%s1014_s0 + $0x170] sm:$0xff] }
   0xd   :  { %v243_v57 = vmul.f32 %v179_v49, %v115_v41  ;;  %v180_v58 = vmul.f32 %v116_v50, %v116_v50  ;;  %v181_v59 = vmul.f32 %v117_v51, %v117_v51  ;;  %v85_v60 = vmax.f32 %v21_v47, 1e-06 }
   0xe   :  { %323 = vadd.xlane.f32.xlu1 %v322_v43  ;;  %v210_v62 = vmul.f32 %v146_v54, %v82_v45  ;;  %v211_v63 = vmul.f32 %v147_v55, %v83_v46  ;;  %v148_v0 = vmul.f32 %v84_v56, %v84_v56  ;;  %v118_v1 = vmax.f32 %v54_v52, 1e-06  ;;  %v61_v45 = vld [vmem:[%s1014_s0 + $0x178] sm:$0xff] }
   0xf   :  { %275 = vadd.xlane.f32.xlu0 %v274_v48  ;;  %v325_v4 = vadd.f32 %v243_v57, %v242_v53  ;;  %v244_v5 = vmul.f32 %v180_v58, %v116_v50  ;;  %v245_v6 = vmul.f32 %v181_v59, %v117_v51  ;;  %v149_v7 = vmul.f32 %v85_v60, %v85_v60  ;;  %v28_v50 = vld [vmem:[%s1014_s0 + $0x70] sm:$0xff]  ;;  %v29_v55 = vld [vmem:[%s1014_s0 + $0x78] sm:$0xff] }
  0x10   :  { %v277_v10 = vadd.f32 %v211_v63, %v210_v62  ;;  %v212_v11 = vmul.f32 %v148_v0, %v84_v56  ;;  %v119_v12 = vmax.f32 %v55_v61, 1e-06  ;;  %v182_v13 = vmul.f32 %v118_v1, %v118_v1 }
  0x11   :  { %v328_v15 = vadd.f32 %v245_v6, %v244_v5  ;;  %v213_v16 = vmul.f32 %v149_v7, %v85_v60  ;;  %v86_v17 = vmax.f32 %v22_v2, 1e-06  ;;  %v87_v18 = vmax.f32 %v23_v3, 1e-06  ;;  %v62_v60 = vld [vmem:[%s1014_s0 + $0x180] sm:$0xff] }
  0x12   :  { %326 = vadd.xlane.f32.xlu1 %v325_v4  ;;  %v183_v20 = vmul.f32 %v119_v12, %v119_v12  ;;  %v246_v21 = vmul.f32 %v182_v13, %v118_v1  ;;  %v120_v22 = vmax.f32 %v56_v8, 1e-06  ;;  %v121_v23 = vmax.f32 %v57_v9, 1e-06 }
  0x13   :  { %278 = vadd.xlane.f32.xlu0 %v277_v10  ;;  %v280_v25 = vadd.f32 %v213_v16, %v212_v11  ;;  %v150_v26 = vmul.f32 %v86_v17, %v86_v17  ;;  %v151_v27 = vmul.f32 %v87_v18, %v87_v18  ;;  %v88_v28 = vmax.f32 %v24_v14, 1e-06 }
  0x14   :  { %v247_v29 = vmul.f32 %v183_v20, %v119_v12  ;;  %v184_v30 = vmul.f32 %v120_v22, %v120_v22  ;;  %v185_v31 = vmul.f32 %v121_v23, %v121_v23  ;;  %v89_v32 = vmax.f32 %v25_v19, 1e-06 }
  0x15   :  { %v214_v34 = vmul.f32 %v150_v26, %v86_v17  ;;  %v215_v35 = vmul.f32 %v151_v27, %v87_v18  ;;  %v152_v36 = vmul.f32 %v88_v28, %v88_v28  ;;  %v122_v37 = vmax.f32 %v58_v24, 1e-06 }
  0x16   :  { %329 = vadd.xlane.f32.xlu1 %v328_v15  ;;  %v331_v40 = vadd.f32 %v247_v29, %v246_v21  ;;  %v248_v41 = vmul.f32 %v184_v30, %v120_v22  ;;  %v249_v42 = vmul.f32 %v185_v31, %v121_v23  ;;  %v153_v43 = vmul.f32 %v89_v32, %v89_v32 }
  0x17   :  { %281 = vadd.xlane.f32.xlu0 %v280_v25  ;;  %v283_v46 = vadd.f32 %v215_v35, %v214_v34  ;;  %v216_v47 = vmul.f32 %v152_v36, %v88_v28  ;;  %v123_v48 = vmax.f32 %v59_v33, 1e-06  ;;  %v186_v49 = vmul.f32 %v122_v37, %v122_v37 }
  0x18   :  { %v334_v51 = vadd.f32 %v249_v42, %v248_v41  ;;  %v217_v52 = vmul.f32 %v153_v43, %v89_v32  ;;  %v90_v53 = vmax.f32 %v26_v38, 1e-06  ;;  %v91_v54 = vmax.f32 %v27_v39, 1e-06 }
  0x19   :  { %v187_v56 = vmul.f32 %v123_v48, %v123_v48  ;;  %v250_v57 = vmul.f32 %v186_v49, %v122_v37  ;;  %v124_v58 = vmax.f32 %v60_v44, 1e-06  ;;  %v125_v59 = vmax.f32 %v61_v45, 1e-06 }
  0x1a   :  { %332 = vadd.xlane.f32.xlu1 %v331_v40  ;;  %v286_v61 = vadd.f32 %v217_v52, %v216_v47  ;;  %v154_v62 = vmul.f32 %v90_v53, %v90_v53  ;;  %v155_v63 = vmul.f32 %v91_v54, %v91_v54  ;;  %v92_v0 = vmax.f32 %v28_v50, 1e-06 }
  0x1b   :  { %6 = vsyncpa [#allocation4], 0  ;;  %284 = vadd.xlane.f32.xlu0 %v283_v46  ;;  %v251_v1 = vmul.f32 %v187_v56, %v123_v48  ;;  %v188_v2 = vmul.f32 %v124_v58, %v124_v58  ;;  %v189_v3 = vmul.f32 %v125_v59, %v125_v59  ;;  %v93_v4 = vmax.f32 %v29_v55, 1e-06  ;;  %v63_v5 = vld [vmem:[%s1014_s0 + $0x188] sm:$0xff]  ;;  %v30_v10 = vld [vmem:[%s1014_s0 + $0x80] sm:$0xff] }
  0x1c   :  { %v218_v6 = vmul.f32 %v154_v62, %v90_v53  ;;  %v219_v7 = vmul.f32 %v155_v63, %v91_v54  ;;  %v156_v8 = vmul.f32 %v92_v0, %v92_v0  ;;  %v126_v9 = vmax.f32 %v62_v60, 1e-06  ;;  %v31_v11 = vld [vmem:[%s1014_s0 + $0x88] sm:$0xff]  ;;  %v64_v16 = vld [vmem:[%s1014_s0 + $0x190] sm:$0xff]  ;;  %v65_v17 = vld [vmem:[%s1014_s0 + $0x198] sm:$0xff] }
  0x1d   :  { %v337_v12 = vadd.f32 %v251_v1, %v250_v57  ;;  %v252_v13 = vmul.f32 %v188_v2, %v124_v58  ;;  %v253_v14 = vmul.f32 %v189_v3, %v125_v59  ;;  %v157_v15 = vmul.f32 %v93_v4, %v93_v4  ;;  %v32_v22 = vld [vmem:[%s1014_s0 + $0x90] sm:$0xff]  ;;  %v33_v27 = vld [vmem:[%s1014_s0 + $0x98] sm:$0xff]  ;;  %v66_v32 = vld [vmem:[%s1014_s0 + $0x1a0] sm:$0xff] }
  0x1e   :  { %335 = vadd.xlane.f32.xlu1 %v334_v51  ;;  %v289_v18 = vadd.f32 %v219_v7, %v218_v6  ;;  %v220_v19 = vmul.f32 %v156_v8, %v92_v0  ;;  %v127_v20 = vmax.f32 %v63_v5, 1e-06  ;;  %v190_v21 = vmul.f32 %v126_v9, %v126_v9  ;;  %v67_v41 = vld [vmem:[%s1014_s0 + $0x1a8] sm:$0xff]  ;;  %v34_v46 = vld [vmem:[%s1014_s0 + $0xa0] sm:$0xff]  ;;  %v68_v51 = vld [vmem:[%s1014_s0 + $0x1b0] sm:$0xff] }
  0x1f   :  { %287 = vadd.xlane.f32.xlu0 %v286_v61  ;;  %v340_v23 = vadd.f32 %v253_v14, %v252_v13  ;;  %v221_v24 = vmul.f32 %v157_v15, %v93_v4  ;;  %v94_v25 = vmax.f32 %v30_v10, 1e-06  ;;  %v95_v26 = vmax.f32 %v31_v11, 1e-06  ;;  %v35_v47 = vld [vmem:[%s1014_s0 + $0xa8] sm:$0xff]  ;;  %v69_v52 = vld [vmem:[%s1014_s0 + $0x1b8] sm:$0xff] }
  0x20   :  { %v191_v28 = vmul.f32 %v127_v20, %v127_v20  ;;  %v254_v29 = vmul.f32 %v190_v21, %v126_v9  ;;  %v128_v30 = vmax.f32 %v64_v16, 1e-06  ;;  %v129_v31 = vmax.f32 %v65_v17, 1e-06  ;;  %v36_v57 = vld [vmem:[%s1014_s0 + $0xb0] sm:$0xff]  ;;  %v37_v62 = vld [vmem:[%s1014_s0 + $0xb8] sm:$0xff] }
  0x21   :  { %v292_v33 = vadd.f32 %v221_v24, %v220_v19  ;;  %v158_v34 = vmul.f32 %v94_v25, %v94_v25  ;;  %v159_v35 = vmul.f32 %v95_v26, %v95_v26  ;;  %v96_v36 = vmax.f32 %v32_v22, 1e-06  ;;  %v70_v3 = vld [vmem:[%s1014_s0 + $0x1c0] sm:$0xff]  ;;  %v72_v22 = vld [vmem:[%s1014_s0 + $0x1d0] sm:$0xff] }
  0x22   :  { %338 = vadd.xlane.f32.xlu1 %v337_v12  ;;  %v255_v37 = vmul.f32 %v191_v28, %v127_v20  ;;  %v192_v38 = vmul.f32 %v128_v30, %v128_v30  ;;  %v193_v39 = vmul.f32 %v129_v31, %v129_v31  ;;  %v97_v40 = vmax.f32 %v33_v27, 1e-06  ;;  %v71_v12 = vld [vmem:[%s1014_s0 + $0x1c8] sm:$0xff]  ;;  %v38_v17 = vld [vmem:[%s1014_s0 + $0xc0] sm:$0xff]  ;;  %v40_v28 = vld [vmem:[%s1014_s0 + $0xd0] sm:$0xff] }
  0x23   :  { %290 = vadd.xlane.f32.xlu0 %v289_v18  ;;  %v222_v42 = vmul.f32 %v158_v34, %v94_v25  ;;  %v223_v43 = vmul.f32 %v159_v35, %v95_v26  ;;  %v160_v44 = vmul.f32 %v96_v36, %v96_v36  ;;  %v130_v45 = vmax.f32 %v66_v32, 1e-06  ;;  %v39_v18 = vld [vmem:[%s1014_s0 + $0xc8] sm:$0xff] }
  0x24   :  { %v256_v48 = vmul.f32 %v192_v38, %v128_v30  ;;  %v257_v49 = vmul.f32 %v193_v39, %v129_v31  ;;  %v161_v50 = vmul.f32 %v97_v40, %v97_v40  ;;  %v343_v53 = vadd.f32 %v255_v37, %v254_v29  ;;  %v74_v38 = vld [vmem:[%s1014_s0 + $0x1e0] sm:$0xff] }
  0x25   :  { %v295_v54 = vadd.f32 %v223_v43, %v222_v42  ;;  %v131_v55 = vmax.f32 %v67_v41, 1e-06  ;;  %v194_v56 = vmul.f32 %v130_v45, %v130_v45  ;;  %v224_v58 = vmul.f32 %v160_v44, %v96_v36 }
  0x26   :  { %341 = vadd.xlane.f32.xlu1 %v340_v23  ;;  %v225_v59 = vmul.f32 %v161_v50, %v97_v40  ;;  %v98_v60 = vmax.f32 %v34_v46, 1e-06  ;;  %v99_v61 = vmax.f32 %v35_v47, 1e-06  ;;  %v132_v1 = vmax.f32 %v68_v51, 1e-06 }
  0x27   :  { %293 = vadd.xlane.f32.xlu0 %v292_v33  ;;  %v195_v63 = vmul.f32 %v131_v55, %v131_v55  ;;  %v258_v0 = vmul.f32 %v194_v56, %v130_v45  ;;  %v133_v2 = vmax.f32 %v69_v52, 1e-06  ;;  %v346_v4 = vadd.f32 %v257_v49, %v256_v48  ;;  %v73_v23 = vld [vmem:[%s1014_s0 + $0x1d8] sm:$0xff]  ;;  %v75_v47 = vld [vmem:[%s1014_s0 + $0x1e8] sm:$0xff]  ;;  %v42_v52 = vld [vmem:[%s1014_s0 + $0xe0] sm:$0xff] }
  0x28   :  { %v162_v5 = vmul.f32 %v98_v60, %v98_v60  ;;  %v163_v6 = vmul.f32 %v99_v61, %v99_v61  ;;  %v100_v7 = vmax.f32 %v36_v57, 1e-06  ;;  %v196_v9 = vmul.f32 %v132_v1, %v132_v1  ;;  %v41_v33 = vld [vmem:[%s1014_s0 + $0xd8] sm:$0xff] }
  0x29   :  { %v259_v8 = vmul.f32 %v195_v63, %v131_v55  ;;  %v197_v10 = vmul.f32 %v133_v2, %v133_v2  ;;  %v101_v11 = vmax.f32 %v37_v62, 1e-06  ;;  %v134_v16 = vmax.f32 %v70_v3, 1e-06 }
  0x2a   :  { %344 = vadd.xlane.f32.xlu1 %v343_v53  ;;  %v226_v13 = vmul.f32 %v162_v5, %v98_v60  ;;  %v227_v14 = vmul.f32 %v163_v6, %v99_v61  ;;  %v164_v15 = vmul.f32 %v100_v7, %v100_v7  ;;  %v298_v19 = vadd.f32 %v225_v59, %v224_v58  ;;  %v43_v53 = vld [vmem:[%s1014_s0 + $0xe8] sm:$0xff]  ;;  %v76_v58 = vld [vmem:[%s1014_s0 + $0x1f0] sm:$0xff]  ;;  %v77_v59 = vld [vmem:[%s1014_s0 + $0x1f8] sm:$0xff] }
  0x2b   :  { %296 = vadd.xlane.f32.xlu0 %v295_v54  ;;  %v349_v20 = vadd.f32 %v259_v8, %v258_v0  ;;  %v165_v21 = vmul.f32 %v101_v11, %v101_v11  ;;  %v260_v24 = vmul.f32 %v196_v9, %v132_v1  ;;  %v261_v25 = vmul.f32 %v197_v10, %v133_v2  ;;  %v44_v0 = vld [vmem:[%s1014_s0 + $0xf0] sm:$0xff]  ;;  %v45_v1 = vld [vmem:[%s1014_s0 + $0xf8] sm:$0xff]  ;;  %s651_s0 = smov [#allocation3]  }
  0x2c   :  { %v135_v26 = vmax.f32 %v71_v12, 1e-06  ;;  %v198_v27 = vmul.f32 %v134_v16, %v134_v16  ;;  %v301_v29 = vadd.f32 %v227_v14, %v226_v13  ;;  %v228_v30 = vmul.f32 %v164_v15, %v100_v7  ;;  %s611_s18 = sshll.u32 %s651_s0, 4  ;;  %s612_s18 = int_to_ptr.vmem [resolvable:$true] %s611_s18 }
  0x2d   :  { %v102_v31 = vmax.f32 %v38_v17, 1e-06  ;;  %v103_v32 = vmax.f32 %v39_v18, 1e-06  ;;  %v229_v34 = vmul.f32 %v165_v21, %v101_v11  ;;  %v136_v36 = vmax.f32 %v72_v22, 1e-06  ;;  %p631_p1 = scmp.lt.s32.totalorder %s612_s18, %s612_s18 }
  0x2e   :  { %347 = vadd.xlane.f32.xlu1 %v346_v4  ;;  %v199_v35 = vmul.f32 %v135_v26, %v135_v26  ;;  %v137_v37 = vmax.f32 %v73_v23, 1e-06  ;;  %v262_v39 = vmul.f32 %v198_v27, %v134_v16  ;;  %v104_v42 = vmax.f32 %v40_v28, 1e-06  ;;  %s626_s19 = scalar_lea.vmem %s612_s18, 32 }
  0x2f   :  { %299 = vadd.xlane.f32.xlu0 %v298_v19  ;;  %v166_v40 = vmul.f32 %v102_v31, %v102_v31  ;;  %v167_v41 = vmul.f32 %v103_v32, %v103_v32  ;;  %v200_v44 = vmul.f32 %v136_v36, %v136_v36  ;;  %v105_v46 = vmax.f32 %v41_v33, 1e-06  ;;  %p627_p0 = scmp.ne.s32.totalorder %s612_s18, %s626_s19  ;;  %p632_p2 = scmp.lt.s32.totalorder %s626_s19, %s626_s19 }
  0x30   :  { %v263_v43 = vmul.f32 %v199_v35, %v135_v26  ;;  %v201_v45 = vmul.f32 %v137_v37, %v137_v37  ;;  %v168_v50 = vmul.f32 %v104_v42, %v104_v42  ;;  %v138_v51 = vmax.f32 %v74_v38, 1e-06 }
  0x31   :  { %v230_v48 = vmul.f32 %v166_v40, %v102_v31  ;;  %v231_v49 = vmul.f32 %v167_v41, %v103_v32  ;;  %v352_v54 = vadd.f32 %v261_v25, %v260_v24  ;;  %v169_v55 = vmul.f32 %v105_v46, %v105_v46  ;;  %p633_p3 = por %p632_p2, %p631_p1 }
  0x32   :  { %350 = vadd.xlane.f32.xlu1 %v349_v20  ;;  %v304_v56 = vadd.f32 %v229_v34, %v228_v30  ;;  %v139_v57 = vmax.f32 %v75_v47, 1e-06  ;;  %v355_v60 = vadd.f32 %v263_v43, %v262_v39  ;;  %v264_v61 = vmul.f32 %v200_v44, %v136_v36 }
  0x33   :  { %302 = vadd.xlane.f32.xlu0 %v301_v29  ;;  %v106_v62 = vmax.f32 %v42_v52, 1e-06  ;;  %v107_v63 = vmax.f32 %v43_v53, 1e-06  ;;  %v307_v2 = vadd.f32 %v231_v49, %v230_v48  ;;  %v265_v3 = vmul.f32 %v201_v45, %v137_v37  ;;  %p634_p4 = pnand %p633_p3, %p627_p0 }
  0x34   :  { %v232_v4 = vmul.f32 %v168_v50, %v104_v42  ;;  %v202_v5 = vmul.f32 %v138_v51, %v138_v51  ;;  %v233_v6 = vmul.f32 %v169_v55, %v105_v46  ;;  %v203_v7 = vmul.f32 %v139_v57, %v139_v57 }
  0x35   :  { %v140_v8 = vmax.f32 %v76_v58, 1e-06  ;;  %v141_v9 = vmax.f32 %v77_v59, 1e-06  ;;  %v170_v10 = vmul.f32 %v106_v62, %v106_v62  ;;  %v171_v11 = vmul.f32 %v107_v63, %v107_v63 }
  0x36   :  { %353 = vadd.xlane.f32.xlu1 %v352_v54  ;;  %v108_v12 = vmax.f32 %v44_v0, 1e-06  ;;  %v109_v13 = vmax.f32 %v45_v1, 1e-06  ;;  %v358_v14 = vadd.f32 %v265_v3, %v264_v61  ;;  %v266_v15 = vmul.f32 %v202_v5, %v138_v51 }
  0x37   :  { %305 = vadd.xlane.f32.xlu0 %v304_v56  ;;  %v310_v16 = vadd.f32 %v233_v6, %v232_v4  ;;  %v267_v17 = vmul.f32 %v203_v7, %v139_v57  ;;  %v204_v18 = vmul.f32 %v140_v8, %v140_v8  ;;  %v205_v19 = vmul.f32 %v141_v9, %v141_v9 }
  0x38   :  { %v234_v20 = vmul.f32 %v170_v10, %v106_v62  ;;  %v235_v21 = vmul.f32 %v171_v11, %v107_v63  ;;  %v172_v22 = vmul.f32 %v108_v12, %v108_v12  ;;  %v173_v23 = vmul.f32 %v109_v13, %v109_v13 }
  0x39   :  { %v361_v24 = vadd.f32 %v267_v17, %v266_v15  ;;  %v268_v25 = vmul.f32 %v204_v18, %v140_v8  ;;  %v269_v26 = vmul.f32 %v205_v19, %v141_v9  ;;  %v650_v32 = vmov 0.0  }
  0x3a   :  { %356 = vadd.xlane.f32.xlu1 %v355_v60  ;;  %v313_v27 = vadd.f32 %v235_v21, %v234_v20  ;;  %v236_v28 = vmul.f32 %v172_v22, %v108_v12  ;;  %v237_v29 = vmul.f32 %v173_v23, %v109_v13  ;;  %13 = vst [vmem:[#allocation2] sm:$0x3] %v650_v32  ;;  %v399_v48 = vlaneseq }
  0x3b   :  { %308 = vadd.xlane.f32.xlu0 %v307_v2  ;;  %v364_v30 = vadd.f32 %v269_v26, %v268_v25  ;;  %vm410_vm0 = vcmask 130112   ;;  %vm417_vm1 = vcmask 195712   ;;  %vm424_vm2 = vcmask 261312  }
  0x3c   :  { %v316_v31 = vadd.f32 %v237_v29, %v236_v28  ;;  %v400_v51 = vand.u32 127, %v399_v48  ;;  %v890_v53 = vshrl.u32 %v399_v48, 7  ;;  %vm431_vm3 = vcmask 326912  }
  0x3d   :  { %vm438_vm4 = vcmask 392512   ;;  %vm445_vm5 = vcmask 458112   ;;  %vm452_vm6 = vcmask 523712   ;;  %vm459_vm7 = vcmask 589312  }
  0x3e   :  { %359 = vadd.xlane.f32.xlu1 %v358_v14  ;;  %v405_v54 = vadd.s32 4294967288, %v400_v51  ;;  %v412_v55 = vadd.s32 4294967280, %v400_v51  ;;  %v419_v57 = vadd.s32 4294967272, %v400_v51  ;;  %v403_v59 = vsub.s32 %v400_v51, %v890_v53 }
  0x3f   :  { %311 = vadd.xlane.f32.xlu0 %v310_v16  ;;  %v426_v61 = vadd.s32 4294967264, %v400_v51  ;;  %v433_v62 = vadd.s32 4294967256, %v400_v51  ;;  %v440_v0 = vadd.s32 4294967248, %v400_v51  ;;  %v447_v1 = vadd.s32 4294967240, %v400_v51 }
  0x40   :  { %v408_v60 = vsub.s32 %v405_v54, %v890_v53  ;;  %v415_v63 = vsub.s32 %v412_v55, %v890_v53  ;;  %v454_v2 = vadd.s32 4294967232, %v400_v51  ;;  %v422_v4 = vsub.s32 %v419_v57, %v890_v53 }
  0x41   :  { %v461_v5 = vadd.s32 4294967224, %v400_v51  ;;  %v468_v6 = vadd.s32 4294967216, %v400_v51  ;;  %v475_v8 = vadd.s32 4294967208, %v400_v51  ;;  %v482_v9 = vadd.s32 4294967200, %v400_v51 }
  0x42   :  { %362 = vadd.xlane.f32.xlu1 %v361_v24  ;;  %v429_v10 = vsub.s32 %v426_v61, %v890_v53  ;;  %v436_v11 = vsub.s32 %v433_v62, %v890_v53  ;;  %v489_v12 = vadd.s32 4294967192, %v400_v51  ;;  %v443_v13 = vsub.s32 %v440_v0, %v890_v53 }
  0x43   :  { %314 = vadd.xlane.f32.xlu0 %v313_v27  ;;  %v450_v14 = vsub.s32 %v447_v1, %v890_v53  ;;  %v909_v15 = vsub.s32 %v454_v2, %v890_v53  ;;  %v496_v17 = vadd.s32 4294967184, %v400_v51  ;;  %v915_v19 = vsub.s32 %v461_v5, %v890_v53 }
  0x44   :  { %v918_v20 = vsub.s32 %v468_v6, %v890_v53  ;;  %v503_v22 = vadd.s32 4294967176, %v400_v51  ;;  %vm466_vm8 = vcmask 654912   ;;  %v925_v25 = vsub.s32 %v475_v8, %v890_v53 }
  0x45   :  { %v928_v26 = vsub.s32 %v482_v9, %v890_v53  ;;  %vm473_vm9 = vcmask 720512   ;;  %vm480_vm10 = vcmask 786112   ;;  %vm487_vm11 = vcmask 851712  }
  0x46   :  { %365 = vadd.xlane.f32.xlu1 %v364_v30  ;;  %v934_v30 = vsub.s32 %v489_v12, %v890_v53  ;;  %v946_v51 = vsub.s32 %v503_v22, %v890_v53  ;;  %vm494_vm12 = vcmask 917312   ;;  %vm501_vm13 = vcmask 982912  }
  0x47   :  { %317 = vadd.xlane.f32.xlu0 %v316_v31  ;;  %vm508_vm14 = vcmask 1048512   ;;  %vm589_vm15 = vcmask 1041409  }
  0x97   :  { %v854_v33 = vpop.xlane.xlu1 %320 }
  0x98   :  { %v856_v34 = vpop.xlane.xlu0 %272  ;;  %v513_v27 = vrot.slane %v854_v33, %v403_v59 }
  0x99   :  { %v404_v31 = vrot.slane %v856_v34, %v403_v59 }
  0x9b   :  { %v858_v35 = vpop.xlane.xlu1 %323 }
  0x9c   :  { %v860_v36 = vpop.xlane.xlu0 %275  ;;  %v517_v18 = vrot.slane %v858_v35, %v408_v60 }
  0x9d   :  { %v409_v23 = vrot.slane %v860_v36, %v408_v60 }
  0x9e   :  { %v518_v33 = vsel %vm410_vm0, %v517_v18, %v513_v27 }
  0x9f   :  { %v862_v37 = vpop.xlane.xlu1 %326  ;;  %v411_v34 = vsel %vm410_vm0, %v409_v23, %v404_v31 }
  0xa0   :  { %v864_v38 = vpop.xlane.xlu0 %278  ;;  %v522_v24 = vrot.slane %v862_v37, %v415_v63  ;;  %v940_v37 = vsub.s32 %v496_v17, %v890_v53 }
  0xa1   :  { %v416_v28 = vrot.slane %v864_v38, %v415_v63 }
  0xa3   :  { %v866_v39 = vpop.xlane.xlu1 %329  ;;  %v418_v55 = vsel %vm417_vm1, %v416_v28, %v411_v34 }
  0xa4   :  { %v868_v40 = vpop.xlane.xlu0 %281  ;;  %v527_v29 = vrot.slane %v866_v39, %v422_v4 }
  0xa5   :  { %v423_v32 = vrot.slane %v868_v40, %v422_v4  ;;  %v523_v40 = vsel %vm417_vm1, %v522_v24, %v518_v33 }
  0xa7   :  { %v870_v41 = vpop.xlane.xlu1 %332  ;;  %v425_v53 = vsel %vm424_vm2, %v423_v32, %v418_v55  ;;  %v270_v32 = vld [vmem:[#allocation2] sm:$0x3] }
  0xa8   :  { %v872_v42 = vpop.xlane.xlu0 %284  ;;  %v532_v35 = vrot.slane %v870_v41, %v429_v10 }
  0xa9   :  { %v430_v38 = vrot.slane %v872_v42, %v429_v10  ;;  %v528_v42 = vsel %vm424_vm2, %v527_v29, %v523_v40 }
  0xaa   :  { %v533_v59 = vsel %vm431_vm3, %v532_v35, %v528_v42 }
  0xab   :  { %v874_v43 = vpop.xlane.xlu1 %335 }
  0xac   :  { %v876_v44 = vpop.xlane.xlu0 %287  ;;  %v537_v39 = vrot.slane %v874_v43, %v436_v11 }
  0xad   :  { %v437_v41 = vrot.slane %v876_v44, %v436_v11 }
  0xae   :  { %v538_v62 = vsel %vm438_vm4, %v537_v39, %v533_v59 }
  0xaf   :  { %v878_v45 = vpop.xlane.xlu1 %338 }
  0xb0   :  { %v880_v46 = vpop.xlane.xlu0 %290  ;;  %v542_v54 = vrot.slane %v878_v45, %v443_v13  ;;  %v432_v45 = vsel %vm431_vm3, %v430_v38, %v425_v53 }
  0xb1   :  { %v444_v43 = vrot.slane %v880_v46, %v443_v13  ;;  %v439_v0 = vsel %vm438_vm4, %v437_v41, %v432_v45 }
  0xb2   :  { %v543_v1 = vsel %vm445_vm5, %v542_v54, %v538_v62 }
  0xb3   :  { %v882_v47 = vpop.xlane.xlu1 %341  ;;  %v446_v2 = vsel %vm445_vm5, %v444_v43, %v439_v0 }
  0xb4   :  { %v884_v49 = vpop.xlane.xlu0 %293  ;;  %v547_v57 = vrot.slane %v882_v47, %v450_v14 }
  0xb5   :  { %v451_v60 = vrot.slane %v884_v49, %v450_v14 }
  0xb6   :  { %v548_v4 = vsel %vm452_vm6, %v547_v57, %v543_v1 }
  0xb7   :  { %v886_v50 = vpop.xlane.xlu1 %344  ;;  %v453_v5 = vsel %vm452_vm6, %v451_v60, %v446_v2 }
  0xb8   :  { %v888_v52 = vpop.xlane.xlu0 %296  ;;  %v552_v44 = vrot.slane %v886_v50, %v909_v15 }
  0xb9   :  { %v458_v63 = vrot.slane %v888_v52, %v909_v15 }
  0xba   :  { %v553_v6 = vsel %vm459_vm7, %v552_v44, %v548_v4 }
  0xbb   :  { %v892_v56 = vpop.xlane.xlu1 %347  ;;  %v460_v9 = vsel %vm459_vm7, %v458_v63, %v453_v5 }
  0xbc   :  { %v894_v58 = vpop.xlane.xlu0 %299  ;;  %v557_v46 = vrot.slane %v892_v56, %v915_v19 }
  0xbd   :  { %v465_v49 = vrot.slane %v894_v58, %v915_v19 }
  0xbe   :  { %v558_v10 = vsel %vm466_vm8, %v557_v46, %v553_v6 }
  0xbf   :  { %v899_v3 = vpop.xlane.xlu1 %350  ;;  %v467_v13 = vsel %vm466_vm8, %v465_v49, %v460_v9 }
  0xc0   :  { %v902_v7 = vpop.xlane.xlu0 %302  ;;  %v562_v50 = vrot.slane %v899_v3, %v918_v20 }
  0xc1   :  { %v472_v52 = vrot.slane %v902_v7, %v918_v20 }
  0xc2   :  { %v563_v14 = vsel %vm473_vm9, %v562_v50, %v558_v10 }
  0xc3   :  { %v911_v16 = vpop.xlane.xlu1 %353  ;;  %v474_v17 = vsel %vm473_vm9, %v472_v52, %v467_v13 }
  0xc4   :  { %v920_v21 = vpop.xlane.xlu0 %305  ;;  %v567_v56 = vrot.slane %v911_v16, %v925_v25 }
  0xc5   :  { %v479_v58 = vrot.slane %v920_v21, %v925_v25 }
  0xc6   :  { %v568_v18 = vsel %vm480_vm10, %v567_v56, %v563_v14 }
  0xc7   :  { %v357_v36 = vpop.xlane.xlu1 %356  ;;  %v481_v20 = vsel %vm480_vm10, %v479_v58, %v474_v17 }
  0xc8   :  { %v309_v48 = vpop.xlane.xlu0 %308  ;;  %v572_v8 = vrot.slane %v357_v36, %v928_v26 }
  0xc9   :  { %v486_v11 = vrot.slane %v309_v48, %v928_v26 }
  0xca   :  { %v573_v21 = vsel %vm487_vm11, %v572_v8, %v568_v18 }
  0xcb   :  { %v360_v61 = vpop.xlane.xlu1 %359  ;;  %v488_v23 = vsel %vm487_vm11, %v486_v11, %v481_v20 }
  0xcc   :  { %v312_v47 = vpop.xlane.xlu0 %311  ;;  %v577_v7 = vrot.slane %v360_v61, %v934_v30 }
  0xcd   :  { %v493_v15 = vrot.slane %v312_v47, %v934_v30 }
  0xce   :  { %v578_v24 = vsel %vm494_vm12, %v577_v7, %v573_v21 }
  0xcf   :  { %v363_v3 = vpop.xlane.xlu1 %362  ;;  %v495_v27 = vsel %vm494_vm12, %v493_v15, %v488_v23 }
  0xd0   :  { %v315_v12 = vpop.xlane.xlu0 %314  ;;  %v582_v16 = vrot.slane %v363_v3, %v940_v37 }
  0xd1   :  { %v500_v19 = vrot.slane %v315_v12, %v940_v37 }
  0xd2   :  { %v583_v28 = vsel %vm501_vm13, %v582_v16, %v578_v24 }
  0xd3   :  { %v366_v22 = vpop.xlane.xlu1 %365  ;;  %v502_v30 = vsel %vm501_vm13, %v500_v19, %v495_v27 }
  0xd4   :  { %v587_v25 = vrot.slane %v366_v22, %v946_v51  ;;  %v318_v26 = vpop.xlane.xlu0 %317 }
  0xd5   :  { %v507_v29 = vrot.slane %v318_v26, %v946_v51 }
  0xd6   :  { %v588_v31 = vsel %vm508_vm14, %v587_v25, %v583_v28 }
  0xd7   :  { %v509_v35 = vsel %vm508_vm14, %v507_v29, %v502_v30 }
  0xd8   :  { %v590_v36 = vsel %vm589_vm15, %v588_v31, %v509_v35 }
  0xd9   :  { %v592_v37 = vadd.f32 %v590_v36, %v270_v32 }
  0xdb   :  { %593 = vst [vmem:[#allocation2] sm:$0x3] %v592_v37 }
  0xe2   :  { %v597_v33 = vld [vmem:[#allocation2] sm:$0x3] }
  0xe3   :  { %622 = vlog2.f32 %v597_v33 }
  0xed   :  { %v623_v38 = vpop.eup %622 }
  0xee   :  { %v599_v39 = vmul.f32 0.6931472, %v623_v38 }
  0xf0   :  { %v619_v48 = vadd.f32 -5.5451775, %v599_v39 }
  0xf2   :  { %v601_v34 = vmul.f32 0.33333334, %v619_v48 }
  0xf4   :  { %v602_v40 = vmul.f32 1.442695, %v601_v34 }
  0xf6   :  { %624 = vpow2.f32 %v602_v40 }
 0x100   :  { %v625_v41 = vpop.eup %624 }
 0x101   :  { %604 = vst [vmem:[#allocation3] sm:$0x3] %v625_v41 }
 0x102   :  { %637 = shalt.err (!%p634_p4)
}
 0x103   :  { %s638_s22 = scalar_lea.hbm %s1015_s1, 32 }
 0x104   :  { %p639_p5 = scmp.ne.s32.totalorder %s1015_s1, %s638_s22  ;;  %p642_p6 = scmp.lt.u32.totalorder %s638_s22, %s1015_s1 }
 0x106   :  { %p644_p7 = pnand %p642_p6, %p639_p5 }
 0x108   :  { %647 = shalt.err (!%p644_p7)
}
 0x109   :  { %614 = dma.vmem_to_hbm [thread:$0]  %s612_s18, 32, %s1015_s1, [#allocation4]  }
 0x10a   :  { %648 = dma.done.wait [#allocation4], 32  }
 0x10b   :  { %649 = vsyncadd [#allocation4], 4294967264 }
 0x10c   :  { %618 = vsyncpa [#allocation4], 1 }

</bundles_post_ra>
